<compile_context>
chip_gen: v7x
topology: tpu7x:2x2x1
jax: 0.10.0
libtpu: 0.0.40
codegen_flags: <defaults>
</compile_context>

<pallas_src>
import functools

import jax
import jax.numpy as jnp
from jax.experimental import pallas as pl
from jax.experimental.pallas import tpu as pltpu

_INV_SQRT2 = 0.7071067811865476
_SQRT_2_OVER_PI = 0.7978845608028654


def _mlp_kernel(x_ref, g_ref, b_ref, w1_ref, b1_ref, w2_ref, b2_ref, o_ref,
                *, compute_dtype, gelu_approx):
    # x_ref: (rows, C) slab of flattened (batch*seq) rows.
    x_in = x_ref[...]
    x = x_in.astype(jnp.float32)

    # ---- LayerNorm in f32 (eps=1e-5, biased variance, like torch.nn.LayerNorm)
    mean = jnp.mean(x, axis=-1, keepdims=True)
    var = jnp.mean((x - mean) ** 2, axis=-1, keepdims=True)
    scale = g_ref[0] * jax.lax.rsqrt(var + 1e-5)          # gamma folded in
    xn = (x - mean) * scale + b_ref[0]                    # (rows, C), f32

    # torch: LayerNorm(x.float()).type(x.dtype) feeds Linear1.
    xn = xn.astype(x_in.dtype).astype(compute_dtype)

    # ---- Linear1 -> GELU -> Linear2 (weights already in compute_dtype,
    #      f32 accumulation on the MXU, f32 bias adds) ----
    h = jnp.dot(xn, w1_ref[...],
                preferred_element_type=jnp.float32) + b1_ref[0]   # (rows, H)
    if gelu_approx:
        # tanh approximation (EUP) — opt-in, not bit-parity with torch default.
        h = 0.5 * h * (1.0 + jnp.tanh(_SQRT_2_OVER_PI * (h + 0.044715 * h * h * h)))
    else:
        # exact GELU (erf), matching torch.nn.GELU() approximate='none'
        h = 0.5 * h * (1.0 + jax.lax.erf(h * _INV_SQRT2))
    y = jnp.dot(h.astype(compute_dtype), w2_ref[...],
                preferred_element_type=jnp.float32) + b2_ref[0]   # (rows, C)
    o_ref[...] = y.astype(o_ref.dtype)


def _round_up(x: int, m: int) -> int:
    return (x + m - 1) // m * m


def _pick_row_block(n: int, compute_dtype) -> int:
    """Row block: multiple of 8, >= 2 grid steps whenever n >= 16.

    Target 1024 rows for bf16 operands (big blocks amortize the ~0.35us
    per-step overhead on v7x's fast HBM); 256 for f32 operands to keep the
    f32 x/xn/h/y chain inside the vreg file on v5e."""
    target = 256 if jnp.dtype(compute_dtype) == jnp.float32 else 1024
    return max(8, min(target, _round_up(-(-n // 2), 8)))


def mlp_forward(x, params, *, compute_dtype=jnp.bfloat16, gelu_approx=False):
    """x: (B, T, C).  Returns (B, T, C) = Linear2(GELU(Linear1(LN(x))))."""
    gamma, beta, w1, b1, w2, b2 = params
    B, T, C = x.shape
    H = w1.shape[1]
    N = B * T

    # One-time wrapper casts: MXU operands in compute_dtype, biases/LN in f32.
    w1c = w1.astype(compute_dtype)
    w2c = w2.astype(compute_dtype)

    rb = _pick_row_block(N, compute_dtype)
    n_blocks = pl.cdiv(N, rb)
    n_pad = n_blocks * rb

    xf = x.reshape(N, C)
    if n_pad != N:
        xf = jnp.pad(xf, ((0, n_pad - N), (0, 0)))        # zero rows, sliced off

    full = lambda i: (0, 0)  # weights/biases: same (whole) block every step
    kernel = functools.partial(_mlp_kernel, compute_dtype=compute_dtype,
                               gelu_approx=gelu_approx)

    x_elt = jnp.dtype(x.dtype).itemsize
    w_elt = jnp.dtype(compute_dtype).itemsize
    cost = pl.CostEstimate(
        flops=4 * n_pad * C * H,                  # two (N,C)x(C,H)-sized matmuls
        transcendentals=n_pad * H,                # erf / tanh
        bytes_accessed=(x_elt * 2 * n_pad * C
                        + w_elt * 2 * C * H
                        + 4 * (2 * C + H + C)),
    )

    out = pl.pallas_call(
        kernel,
        out_shape=jax.ShapeDtypeStruct((n_pad, C), x.dtype),
        grid=(n_blocks,),
        in_specs=[
            pl.BlockSpec((rb, C), lambda i: (i, 0)),   # x rows
            pl.BlockSpec((1, C), full),                # ln gamma (f32)
            pl.BlockSpec((1, C), full),                # ln beta  (f32)
            pl.BlockSpec((C, H), full),                # W1 (compute_dtype)
            pl.BlockSpec((1, H), full),                # b1 (f32)
            pl.BlockSpec((H, C), full),                # W2 (compute_dtype)
            pl.BlockSpec((1, C), full),                # b2 (f32)
        ],
        out_specs=pl.BlockSpec((rb, C), lambda i: (i, 0)),
        compiler_params=pltpu.CompilerParams(
            dimension_semantics=("parallel",)),
        cost_estimate=cost,
    )(xf, gamma, beta, w1c, b1, w2c, b2)

    return out[:N].reshape(B, T, C)


def mlp_reference(x, params):
    """Pure-JAX reference reproducing MLP.forward semantics."""
    gamma, beta, w1, b1, w2, b2 = params
    xf = x.astype(jnp.float32)
    mean = jnp.mean(xf, axis=-1, keepdims=True)
    var = jnp.mean((xf - mean) ** 2, axis=-1, keepdims=True)
    xn = (xf - mean) / jnp.sqrt(var + 1e-5) * gamma[0] + beta[0]
    xn = xn.astype(x.dtype)
    h = xn @ w1 + b1[0]
    h = 0.5 * h * (1.0 + jax.lax.erf(h * _INV_SQRT2))
    return (h @ w2 + b2[0]).astype(x.dtype)


def init_params(key, channels: int, expansion: int):
    C, H = channels, channels * expansion
    ks = jax.random.split(key, 4)
    gamma = jnp.ones((1, C), jnp.float32)
    beta = jnp.zeros((1, C), jnp.float32)
    w1 = jax.random.uniform(ks[0], (C, H), jnp.float32, -1, 1) / (C ** 0.5)
    b1 = jax.random.uniform(ks[1], (1, H), jnp.float32, -1, 1) / (C ** 0.5)
    w2 = jax.random.uniform(ks[2], (H, C), jnp.float32, -1, 1) / (H ** 0.5)
    b2 = jax.random.uniform(ks[3], (1, C), jnp.float32, -1, 1) / (H ** 0.5)
    return gamma, beta, w1, b1, w2, b2


if __name__ == "__main__":
    # Module config: channels=32, expansion=4 -> hidden=128; x is (B, T, C).
    B, T, C, expansion = 2, 8, 32, 4

    key = jax.random.PRNGKey(0)
    kx, kp = jax.random.split(key)
    x = jax.random.normal(kx, (B, T, C), jnp.float32)
    params = init_params(kp, C, expansion)

    ref = mlp_reference(x, params)

    # Default path: bf16 MXU operands, f32 LN + accumulation (loosened tol).
    out = jax.block_until_ready(mlp_forward(x, params))
    assert out.shape == (B, T, C)
    assert jnp.allclose(out, ref, atol=5e-2, rtol=5e-2), \
        f"bf16 max abs err {jnp.max(jnp.abs(out - ref))}"

    # Full-f32 operand path: tight tolerance against the torch-style reference.
    out_f32 = jax.block_until_ready(
        mlp_forward(x, params, compute_dtype=jnp.float32))
    assert jnp.allclose(out_f32, ref, atol=1e-4, rtol=1e-4), \
        f"f32 max abs err {jnp.max(jnp.abs(out_f32 - ref))}"

    # Non-multiple-of-block-rows shape exercises the cdiv + padding path.
    x_odd = jax.random.normal(kx, (3, 7, C), jnp.float32)
    out_odd = jax.block_until_ready(
        mlp_forward(x_odd, params, compute_dtype=jnp.float32))
    assert jnp.allclose(out_odd, mlp_reference(x_odd, params),
                        atol=1e-4, rtol=1e-4)

    print("KERNEL_OK")
</pallas_src>

<mosaic_0001>
module attributes {stable_mosaic.version = 11 : i64} {
  func.func @_mlp_kernel(%arg0: i32, %arg1: memref<8x32xf32, #tpu.memory_space<vmem>>, %arg2: memref<1x32xf32, #tpu.memory_space<vmem>>, %arg3: memref<1x32xf32, #tpu.memory_space<vmem>>, %arg4: memref<32x128xbf16, #tpu.memory_space<vmem>>, %arg5: memref<1x128xf32, #tpu.memory_space<vmem>>, %arg6: memref<128x32xbf16, #tpu.memory_space<vmem>>, %arg7: memref<1x32xf32, #tpu.memory_space<vmem>>, %arg8: memref<8x32xf32, #tpu.memory_space<vmem>>) attributes {dimension_semantics = [#tpu.dimension_semantics<parallel>], iteration_bounds = array<i64: 2>, scalar_prefetch = 0 : i64, scratch_operands = 0 : i64, tpu.core_type = #tpu.core_type<tc>, window_params = [{transform_indices = @transform_0, window_bounds = array<i64: 8, 32>}, {pipeline_mode = #tpu.pipeline_mode<synchronous>, transform_indices = @transform_1, window_bounds = array<i64: 1, 32>}, {pipeline_mode = #tpu.pipeline_mode<synchronous>, transform_indices = @transform_2, window_bounds = array<i64: 1, 32>}, {pipeline_mode = #tpu.pipeline_mode<synchronous>, transform_indices = @transform_3, window_bounds = array<i64: 32, 128>}, {pipeline_mode = #tpu.pipeline_mode<synchronous>, transform_indices = @transform_4, window_bounds = array<i64: 1, 128>}, {pipeline_mode = #tpu.pipeline_mode<synchronous>, transform_indices = @transform_5, window_bounds = array<i64: 128, 32>}, {pipeline_mode = #tpu.pipeline_mode<synchronous>, transform_indices = @transform_6, window_bounds = array<i64: 1, 32>}, {transform_indices = @transform_7, window_bounds = array<i64: 8, 32>}]} {
    %c0 = arith.constant 0 : index
    %c0_0 = arith.constant 0 : index
    %0 = vector.load %arg1[%c0, %c0_0] : memref<8x32xf32, #tpu.memory_space<vmem>>, vector<8x32xf32>
    %cst = arith.constant dense<0.000000e+00> : vector<8xf32>
    %1 = vector.multi_reduction <add>, %0, %cst [1] : vector<8x32xf32> to vector<8xf32>
    %2 = vector.shape_cast %1 : vector<8xf32> to vector<8x1xf32>
    %cst_1 = arith.constant 3.200000e+01 : f32
    %3 = vector.broadcast %cst_1 : f32 to vector<8x1xf32>
    %4 = arith.divf %2, %3 : vector<8x1xf32>
    %5 = vector.broadcast %4 : vector<8x1xf32> to vector<8x32xf32>
    %6 = arith.subf %0, %5 : vector<8x32xf32>
    %7 = arith.mulf %6, %6 : vector<8x32xf32>
    %cst_2 = arith.constant dense<0.000000e+00> : vector<8xf32>
    %8 = vector.multi_reduction <add>, %7, %cst_2 [1] : vector<8x32xf32> to vector<8xf32>
    %9 = vector.shape_cast %8 : vector<8xf32> to vector<8x1xf32>
    %cst_3 = arith.constant 3.200000e+01 : f32
    %10 = vector.broadcast %cst_3 : f32 to vector<8x1xf32>
    %11 = arith.divf %9, %10 : vector<8x1xf32>
    %c0_4 = arith.constant 0 : index
    %c0_5 = arith.constant 0 : index
    %12 = vector.load %arg2[%c0_4, %c0_5] : memref<1x32xf32, #tpu.memory_space<vmem>>, vector<1x32xf32>
    %13 = vector.shape_cast %12 : vector<1x32xf32> to vector<32xf32>
    %cst_6 = arith.constant 9.99999974E-6 : f32
    %14 = vector.broadcast %cst_6 : f32 to vector<8x1xf32>
    %15 = arith.addf %11, %14 : vector<8x1xf32>
    %16 = math.rsqrt %15 : vector<8x1xf32>
    %17 = vector.shape_cast %13 : vector<32xf32> to vector<1x32xf32>
    %18 = vector.broadcast %17 : vector<1x32xf32> to vector<8x32xf32>
    %19 = vector.broadcast %16 : vector<8x1xf32> to vector<8x32xf32>
    %20 = arith.mulf %18, %19 : vector<8x32xf32>
    %21 = vector.broadcast %4 : vector<8x1xf32> to vector<8x32xf32>
    %22 = arith.subf %0, %21 : vector<8x32xf32>
    %23 = arith.mulf %22, %20 : vector<8x32xf32>
    %c0_7 = arith.constant 0 : index
    %c0_8 = arith.constant 0 : index
    %24 = vector.load %arg3[%c0_7, %c0_8] : memref<1x32xf32, #tpu.memory_space<vmem>>, vector<1x32xf32>
    %25 = vector.shape_cast %24 : vector<1x32xf32> to vector<32xf32>
    %26 = vector.shape_cast %25 : vector<32xf32> to vector<1x32xf32>
    %27 = vector.broadcast %26 : vector<1x32xf32> to vector<8x32xf32>
    %28 = arith.addf %23, %27 : vector<8x32xf32>
    %29 = arith.truncf %28 : vector<8x32xf32> to vector<8x32xbf16>
    %c0_9 = arith.constant 0 : index
    %c0_10 = arith.constant 0 : index
    %30 = vector.load %arg4[%c0_9, %c0_10] : memref<32x128xbf16, #tpu.memory_space<vmem>>, vector<32x128xbf16>
    %cst_11 = arith.constant dense<0.000000e+00> : vector<8x128xf32>
    %31 = tpu.matmul %29, %30, %cst_11 {dimension_numbers = #tpu.dot_dimension_numbers<[1], [0], [0], [1], [0, 0, 1, 1], [], []>} : vector<8x32xbf16>, vector<32x128xbf16>, vector<8x128xf32> -> vector<8x128xf32>
    %c0_12 = arith.constant 0 : index
    %c0_13 = arith.constant 0 : index
    %32 = vector.load %arg5[%c0_12, %c0_13] : memref<1x128xf32, #tpu.memory_space<vmem>>, vector<1x128xf32>
    %33 = vector.shape_cast %32 : vector<1x128xf32> to vector<128xf32>
    %34 = vector.shape_cast %33 : vector<128xf32> to vector<1x128xf32>
    %35 = vector.broadcast %34 : vector<1x128xf32> to vector<8x128xf32>
    %36 = arith.addf %31, %35 : vector<8x128xf32>
    %cst_14 = arith.constant 5.000000e-01 : f32
    %37 = vector.broadcast %cst_14 : f32 to vector<8x128xf32>
    %38 = arith.mulf %37, %36 : vector<8x128xf32>
    %cst_15 = arith.constant 0.707106769 : f32
    %39 = vector.broadcast %cst_15 : f32 to vector<8x128xf32>
    %40 = arith.mulf %36, %39 : vector<8x128xf32>
    %41 = math.erf %40 : vector<8x128xf32>
    %cst_16 = arith.constant 1.000000e+00 : f32
    %42 = vector.broadcast %cst_16 : f32 to vector<8x128xf32>
    %43 = arith.addf %42, %41 : vector<8x128xf32>
    %44 = arith.mulf %38, %43 : vector<8x128xf32>
    %45 = arith.truncf %44 : vector<8x128xf32> to vector<8x128xbf16>
    %c0_17 = arith.constant 0 : index
    %c0_18 = arith.constant 0 : index
    %46 = vector.load %arg6[%c0_17, %c0_18] : memref<128x32xbf16, #tpu.memory_space<vmem>>, vector<128x32xbf16>
    %cst_19 = arith.constant dense<0.000000e+00> : vector<8x32xf32>
    %47 = tpu.matmul %45, %46, %cst_19 {dimension_numbers = #tpu.dot_dimension_numbers<[1], [0], [0], [1], [0, 0, 1, 1], [], []>} : vector<8x128xbf16>, vector<128x32xbf16>, vector<8x32xf32> -> vector<8x32xf32>
    %c0_20 = arith.constant 0 : index
    %c0_21 = arith.constant 0 : index
    %48 = vector.load %arg7[%c0_20, %c0_21] : memref<1x32xf32, #tpu.memory_space<vmem>>, vector<1x32xf32>
    %49 = vector.shape_cast %48 : vector<1x32xf32> to vector<32xf32>
    %50 = vector.shape_cast %49 : vector<32xf32> to vector<1x32xf32>
    %51 = vector.broadcast %50 : vector<1x32xf32> to vector<8x32xf32>
    %52 = arith.addf %47, %51 : vector<8x32xf32>
    %c0_22 = arith.constant 0 : index
    %c0_23 = arith.constant 0 : index
    %53 = vector.load %arg8[%c0_22, %c0_23] : memref<8x32xf32, #tpu.memory_space<vmem>>, vector<8x32xf32>
    tpu.vector_store %arg8[%c0_22, %c0_23], %52 {strides = array<i32>} : memref<8x32xf32, #tpu.memory_space<vmem>>, vector<8x32xf32>,
    return
  }
  func.func @transform_0(%arg0: i32) -> (i32, i32) {
    %c0_i32 = arith.constant 0 : i32
    %c0_i32_0 = arith.constant 0 : i32
    return %arg0, %c0_i32 : i32, i32
  }
  func.func @transform_1(%arg0: i32) -> (i32, i32) {
    %c0_i32 = arith.constant 0 : i32
    %c0_i32_0 = arith.constant 0 : i32
    %c0_i32_1 = arith.constant 0 : i32
    return %c0_i32, %c0_i32_0 : i32, i32
  }
  func.func @transform_2(%arg0: i32) -> (i32, i32) {
    %c0_i32 = arith.constant 0 : i32
    %c0_i32_0 = arith.constant 0 : i32
    %c0_i32_1 = arith.constant 0 : i32
    return %c0_i32, %c0_i32_0 : i32, i32
  }
  func.func @transform_3(%arg0: i32) -> (i32, i32) {
    %c0_i32 = arith.constant 0 : i32
    %c0_i32_0 = arith.constant 0 : i32
    %c0_i32_1 = arith.constant 0 : i32
    return %c0_i32, %c0_i32_0 : i32, i32
  }
  func.func @transform_4(%arg0: i32) -> (i32, i32) {
    %c0_i32 = arith.constant 0 : i32
    %c0_i32_0 = arith.constant 0 : i32
    %c0_i32_1 = arith.constant 0 : i32
    return %c0_i32, %c0_i32_0 : i32, i32
  }
  func.func @transform_5(%arg0: i32) -> (i32, i32) {
    %c0_i32 = arith.constant 0 : i32
    %c0_i32_0 = arith.constant 0 : i32
    %c0_i32_1 = arith.constant 0 : i32
    return %c0_i32, %c0_i32_0 : i32, i32
  }
  func.func @transform_6(%arg0: i32) -> (i32, i32) {
    %c0_i32 = arith.constant 0 : i32
    %c0_i32_0 = arith.constant 0 : i32
    %c0_i32_1 = arith.constant 0 : i32
    return %c0_i32, %c0_i32_0 : i32, i32
  }
  func.func @transform_7(%arg0: i32) -> (i32, i32) {
    %c0_i32 = arith.constant 0 : i32
    %c0_i32_0 = arith.constant 0 : i32
    return %arg0, %c0_i32 : i32, i32
  }
}

</mosaic_0001>

<bundles_post_ra>
// kernel: tpu_custom_call.1
= control target key start
LH: loop header
LB: loop body
LE: loop exit
PB: predicated region body
PF: predicated region fallthrough
CT: control target
= control target key end

     0   :  { %12 = vsyncpa [#allocation3], 0  ;;  %s938_s0 = inlined_call_operand.vmem [shape: f32[16,32], index: 0, kind: input, shape index: {}]   ;;  %s939_s1 = inlined_call_operand.vmem [shape: f32[1,32], index: 1, kind: input, shape index: {}]   ;;  %s940_s2 = inlined_call_operand.vmem [shape: f32[1,32], index: 2, kind: input, shape index: {}]   ;;  %s941_s3 = inlined_call_operand.vmem [shape: bf16[32,128], index: 3, kind: input, shape index: {}]   ;;  %s942_s4 = inlined_call_operand.vmem [shape: f32[1,128], index: 4, kind: input, shape index: {}]   ;;  %s943_s5 = inlined_call_operand.vmem [shape: bf16[128,32], index: 5, kind: input, shape index: {}]   ;;  %s944_s6 = inlined_call_operand.vmem [shape: f32[1,32], index: 6, kind: input, shape index: {}]   ;;  %s945_s7 = inlined_call_operand.hbm [shape: f32[16,32], index: 7, kind: output, shape index: {}]  }
   0x1   :  { %14 = vsyncpa [#allocation3 + $0x1], 0  ;;  %s792_s24 = smov 0   ;;  %s794_s25 = smov 0  }
   0x2   :  { %s796_s26 = smov 0   ;;  %s798_s27 = smov 0  }
   0x3 LB: > { %s813_s28 = sadd.s32 4294967295, %s747_s27   ;;  %s565_s29 = sadd.s32 4294967294, %s747_s27   ;;  %s747_s27 = sphi %s798_s27, %s951_s27   ;;  %s743_s26 = sphi %s796_s26, %s950_s26   ;;  %s739_s25 = sphi %s794_s25, %s949_s25   ;;  %s735_s24 = sphi %s792_s24, %s948_s24  }
   0x4   : > { %s817_s30 = sadd.s32 1, %s747_s27   ;;  %s179_s8 = sadd.s32 1, %s743_s26 }
   0x5   : > { %s176_s9 = ssub.s32 %s747_s27, %s817_s30  ;;  %p189_p0 = scmp.ne.s32.totalorder %s743_s26, %s739_s25 }
   0x6   : > { %p177_p1 = scmp.eq.s32.totalorder %s176_s9, 0  ;;  %p190_p2 = scmp.eq.s32.totalorder %s813_s28, 1 }
   0x7   : > { %p195_p3 = scmp.ne.s32.totalorder %s739_s25, %s735_s24  ;;  %p196_p4 = scmp.eq.s32.totalorder %s565_s29, 1 }
   0x8   : > { %s828_s10 = scalar_select %p177_p1, %s743_s26, %s179_s8  }
   0x9   : > { %p830_p5 = por %p190_p2, %p189_p0  ;;  %p834_p6 = por %p196_p4, %p195_p3 }
   0xa   : > { %p568_p7 = scmp.ge.s32.totalorder %s747_s27, 1  ;;  %p239_p8 = scmp.lt.s32.totalorder %s747_s27, 3 }
   0xc   : > { %p240_p9 = pnand %p568_p7, %p239_p8 }
   0xd   : > { %p270_p10 = scmp.lt.s32.totalorder (!%p240_p9), %s813_s28, 1  ;;  %vm276_vm0 = vcmask (!%p240_p9), 261120   ;;  %v671_v7 = vld [vmem:[%s941_s3] sm:$0xff] (!%p240_p9)   ;;  %v749_v8 = vmov (!%p240_p9), 0.0   ;;  %v672_v9 = vld [vmem:[%s941_s3 + $0x8] sm:$0xff] (!%p240_p9)   ;;  %vm750_vm1 = vmmov (!%p240_p9), 0  }
   0xe   : > { %243 = sbr.rel (%p240_p9) target bundleno = 802 (0x322), region = 48  ;;  %602 = vmatprep.subr.bf16.mxu0 (!%p240_p9), %v749_v8  ;;  %610 = vmatprep.subr.bf16.mxu1 (!%p240_p9), %v749_v8  ;;  %v673_v10 = vld [vmem:[%s943_s5] sm:$0xff] (!%p240_p9)   ;;  %v674_v11 = vld [vmem:[%s943_s5 + $0x8] sm:$0xff] (!%p240_p9)   ;;  %v675_v12 = vld [vmem:[%s943_s5 + $0x10] sm:$0xff] (!%p240_p9)   ;;  %s267_s16 = sand.u32 (!%p240_p9), 1, %s739_s25  }
   0xf   : > { %603 = vmatpush3.bf16.msra.mxu0 (!%p240_p9), %v671_v7  ;;  %606 = vmatprep.mubr.msk.bf16.mxu0 (!%p240_p9), %vm750_vm1, %v749_v8  ;;  %v571_v16 = vld [vmem:[%s939_s1] ss:$0 sm:$0xff] (!%p240_p9)  ;;  %v676_v23 = vld [vmem:[%s943_s5 + $0x18] sm:$0xff] (!%p240_p9)   ;;  %v678_v25 = vld [vmem:[%s943_s5 + $0x28] sm:$0xff] (!%p240_p9)   ;;  %s587_s20 = sshll.u32 (!%p240_p9), %s813_s28, 7 }
  0x10   : > { %604 = vmatprep.subr.bf16.mxu0 (!%p240_p9), %v749_v8  ;;  %626 = vmatprep.mubr.msk.bf16.mxu1 (!%p240_p9), %vm750_vm1, %v749_v8  ;;  %v572_v19 = vld [vmem:[%s940_s2] ss:$0 sm:$0xff] (!%p240_p9)  ;;  %v679_v26 = vld [vmem:[%s943_s5 + $0x30] sm:$0xff] (!%p240_p9)   ;;  %v680_v27 = vld [vmem:[%s943_s5 + $0x38] sm:$0xff] (!%p240_p9)   ;;  %s895_s8 = scalar_lea.hbm (!%p240_p9), %s945_s7, %s587_s20 }
  0x11   : > { %611 = vmatpush3.bf16.msra.mxu1 (!%p240_p9), %v673_v10  ;;  %v677_v24 = vld [vmem:[%s943_s5 + $0x20] sm:$0xff] (!%p240_p9)  }
  0x12   : > { %612 = vmatprep.subr.bf16.mxu1 (!%p240_p9), %v749_v8  ;;  %v573_v28 = vld [vmem:[%s942_s4] ss:$0 sm:$0xff] (!%p240_p9) }
  0x13   : > { %605 = vmatpush3.bf16.msra.mxu0 (!%p240_p9), %v672_v9  ;;  %v577_v40 = vld [vmem:[%s944_s6] ss:$0 sm:$0xff] (!%p240_p9) }
  0x15   : > { %s271_s13 = scalar_select %p270_p10, %s813_s28, 1  ;;  %613 = vmatpush3.bf16.msra.mxu1 %v674_v11 }
  0x16   : > { %614 = vmatprep.subr.bf16.mxu1 %v749_v8  ;;  %s493_s28 = scalar_lea.sflag [#allocation3], %s267_s16 }
  0x17   : > { %s570_s14 = sshll.u32 %s271_s13, 3  ;;  %s751_s13 = smov [#allocation2]  }
  0x18   : > { %s273_s17 = scalar_lea.vmem %s938_s0, %s570_s14  ;;  %s689_s14 = sshll.u32 %s751_s13, 4  ;;  %s690_s14 = int_to_ptr.vmem [resolvable:$false] %s689_s14 }
  0x19   : > { %v275_v0 = vld [vmem:[%s273_s17] sm:$0xff]  ;;  %615 = vmatpush3.bf16.msra.mxu1 %v675_v12  ;;  %s569_s17 = sshll.u32 %s267_s16, 3  ;;  %s691_s15 = scalar_lea.vmem %s690_s14, 256 }
  0x1a   : > { %v277_v1 = vsel %vm276_vm0, %v275_v0, 0.0  ;;  %616 = vmatprep.subr.bf16.mxu1 %v749_v8  ;;  %s269_s21 = scalar_lea.vmem [#allocation2], %s569_s17 }
  0x1b   : > { %278 = vadd.xlane.f32.xlu0 %v277_v1  ;;  %s506_s22 = sshll.u32 %s269_s21, 4  ;;  %s897_s22 = int_to_ptr.vmem [resolvable:$true] %s506_s22 }
  0x1c   : > { %s685_s9 = scalar_lea.vmem %s897_s22, 128  ;;  %p692_p0 = scmp.lt.s32.totalorder %s897_s22, %s690_s14 }
  0x1d   : > { %617 = vmatpush3.bf16.msra.mxu1 %v676_v23  ;;  %p686_p11 = scmp.ne.s32.totalorder %s897_s22, %s685_s9  ;;  %p693_p1 = scmp.lt.s32.totalorder %s691_s15, %s685_s9 }
  0x1e   : > { %618 = vmatprep.subr.bf16.mxu1 %v749_v8 }
  0x1f   : > { %p687_p12 = pnand %p686_p11, %p830_p5  ;;  %p694_p2 = por %p693_p1, %p692_p0 }
  0x21   : > { %619 = vmatpush3.bf16.msra.mxu1 %v677_v24  ;;  %p688_p13 = pneg %p687_p12 }
  0x22   : > { %620 = vmatprep.subr.bf16.mxu1 %v749_v8 }
  0x23   : > { %p695_p3 = pnand %p694_p2, %p688_p13 }
  0x25   : > { %621 = vmatpush3.bf16.msra.mxu1 %v678_v25 }
  0x26   : > { %622 = vmatprep.subr.bf16.mxu1 %v749_v8 }
  0x29   : > { %623 = vmatpush3.bf16.msra.mxu1 %v679_v26 }
  0x2a   : > { %624 = vmatprep.subr.bf16.mxu1 %v749_v8 }
  0x2d   : > { %625 = vmatpush3.bf16.msra.mxu1 %v680_v27 }
  0xa8   : > { %v279_v2 = vpop.xlane.xlu0 %278 }
  0xa9   : > { %v281_v3 = vmul.f32 0.03125, %v279_v2 }
  0xab   : > { %v282_v4 = vsub.f32 %v275_v0, %v281_v3 }
  0xad   : > { %v283_v5 = vmul.f32 %v282_v4, %v282_v4 }
  0xaf   : > { %v284_v6 = vsel %vm276_vm0, %v283_v5, 0.0 }
  0xb0   : > { %285 = vadd.xlane.f32.xlu0 %v284_v6 }
 0x13d   : > { %v286_v13 = vpop.xlane.xlu0 %285 }
 0x13e   : > { %v287_v14 = vmul.f32 0.03125, %v286_v13 }
 0x140   : > { %v289_v15 = vadd.f32 1e-05, %v287_v14 }
 0x142   : > { %681 = vrsqrt.f32 %v289_v15 }
 0x14c   : > { %v682_v17 = vpop.eup %681 }
 0x14d   : > { %v297_v18 = vmul.f32 %v682_v17, %v571_v16 }
 0x14f   : > { %v298_v20 = vmul.f32 %v297_v18, %v282_v4 }
 0x151   : > { %v306_v21 = vadd.f32 %v572_v19, %v298_v20 }
 0x153   : > { %v307_v22 = vpack.c.bf16 %v306_v21, %v306_v21 }
 0x155   : > { %607 = vmatmul.mubr.msk.bf16.vlgmr.msra.gmra.mrb[0].mxu0 %vm276_vm0, %v307_v22 }
 0x228   : > { %v368_v29 = vpop.f32.mrb[0].mxu0 }
 0x229   : > { %v369_v30 = vadd.f32 %v573_v28, %v368_v29  ;;  %v608_v31 = vpop.f32.mrb[1].mxu0 }
 0x22a   : > { %v371_v32 = vpop.f32.mrb[2].mxu0 }
 0x22b   : > { %v375_v33 = vmul.f32 0.70710677, %v369_v30  ;;  %v609_v34 = vpop.f32.mrb[3].mxu0  ;;  %v374_v36 = vmul.f32 0.5, %v369_v30 }
 0x22d   : > { %683 = verf.f32 %v375_v33 }
 0x237   : > { %v684_v35 = vpop.eup %683 }
 0x238   : > { %v377_v37 = vadd.f32 1.0, %v684_v35 }
 0x23a   : > { %v378_v38 = vmul.f32 %v377_v37, %v374_v36 }
 0x23c   : > { %v379_v39 = vpack.c.bf16 %v378_v38, %v378_v38 }
 0x23e   : > { %627 = vmatmul.mubr.bf16.vlgmr.msra.gmra.mrb[0].mxu1 %v379_v39 }
 0x311   : > { %v485_v41 = vpop.f32.mrb[0].mxu1 }
 0x312   : > { %v486_v42 = vadd.f32 %v577_v40, %v485_v41  ;;  %v628_v43 = vpop.f32.mrb[1].mxu1 }
 0x313   : > { %v488_v44 = vpop.f32.mrb[2].mxu1 }
 0x314   : > { %v629_v45 = vpop.f32.mrb[3].mxu1  ;;  %491 = vst.msk [vmem:[%s269_s21] sm:$0xff] %vm276_vm0, %v486_v42 }
 0x315   : > { %698 = shalt.err (!%p695_p3)
}
 0x316   : > { %s699_s16 = scalar_lea.hbm %s895_s8, 128  ;;  %s703_s19 = scalar_lea.hbm %s945_s7, 256 }
 0x317   : > { %p700_p4 = scmp.ne.s32.totalorder %s895_s8, %s699_s16  ;;  %p704_p9 = scmp.lt.u32.totalorder %s895_s8, %s945_s7 }
 0x318   : > { %p705_p10 = scmp.lt.u32.totalorder %s703_s19, %s699_s16  ;;  %p707_p12 = scmp.lt.u32.totalorder %s699_s16, %s895_s8 }
 0x319   : > { %p701_p7 = pnand %p700_p4, %p830_p5 }
 0x31a   : > { %p706_p11 = por %p705_p10, %p704_p9 }
 0x31b   : > { %p702_p8 = pneg %p701_p7 }
 0x31c   : > { %p708_p13 = por %p707_p12, %p706_p11 }
 0x31e   : > { %p709_p0 = pnand %p708_p13, %p702_p8 }
 0x320   : > { %712 = shalt.err (!%p709_p0)
}
 0x321   : > { %630 = dma.vmem_to_hbm [thread:$0]  (%p830_p5), %s897_s22, 128, %s895_s8, %s493_s28  }
 0x322 PF: > { %p636_p1 = scmp.ge.s32.totalorder %s747_s27, 2  ;;  %s518_s23 = sand.u32 1, %s735_s24  }
 0x323   : > { %s519_s29 = scalar_lea.sflag [#allocation3], %s518_s23 }
 0x324   : > { %p633_p2 = pnand %p636_p1, %p834_p6 }
 0x326   : > { %730 = dma.done.wait (!%p633_p2), %s519_s29, 128  }
 0x327   : > { %732 = vsyncadd (!%p633_p2), %s519_s29, 4294967168  ;;  %p17_p3 = scmp.ge.s32.totalorder %s817_s30, 4   ;;  %s948_s24 = smov %s739_s25 }
 0x328   : > { %s949_s25 = smov %s743_s26  ;;  %s950_s26 = smov %s828_s10 }
 0x329   : > { %s951_s27 = smov %s817_s30  ;;  %19 = sbr.rel (!%p17_p3) target bundleno = 3 (0x3), region = 83 }
 0x330   :  { %524 = vsyncpa [#allocation3], 1 }
 0x331   :  { %526 = vsyncpa [#allocation3 + $0x1], 1 }

</bundles_post_ra>
